<compile_context>
chip_gen: v7x
topology: tpu7x:2x2x1
jax: 0.10.0
libtpu: 0.0.40
codegen_flags: <defaults>
</compile_context>

<pallas_src>
import math
from functools import partial

import jax
import jax.numpy as jnp
from jax.experimental import pallas as pl
from jax.experimental.pallas import tpu as pltpu


# ----------------------------------------------------------------------------
# Fused ELLA + tiny-UNet kernel (per-batch grid), transposed (channels-first) layout:
#   AdaLN(enc, t) -> k/v (ELLA proj folded in)
#   conv_in (1x1) -> + time channel bias -> cross-attn(text) -> conv_out (1x1)
# ----------------------------------------------------------------------------
def _fused_kernel(x_ref, enc_ref, rowvec_ref, colvec_ref,
                  wcin_t_ref, wq_t_ref, wk_ref, wv_ref, wo_t_ref, wcout_t_ref,
                  out_ref):
    x_t = x_ref[0]                        # [Cin, HW]   (channels on sublane, HW on lane)
    enc = enc_ref[0]                      # [S, D]

    D = enc.shape[-1]
    Cmid = wq_t_ref.shape[0]
    Cout = wcout_t_ref.shape[0]

    # ---- ELLA AdaLN (timestep-modulated LayerNorm over D), fused in ----
    mean = jnp.mean(enc, axis=-1, keepdims=True)
    var = jnp.mean((enc - mean) ** 2, axis=-1, keepdims=True)
    enc_hat = (enc - mean) * jax.lax.rsqrt(var + 1e-6)
    scale = rowvec_ref[0:1, :D]           # [1, D]
    shift = rowvec_ref[1:2, :D]           # [1, D]
    h = enc_hat * (1.0 + scale) + shift   # [S, D]

    # ---- k/v with the ELLA output projection folded into the weights ----
    k = jnp.dot(h, wk_ref[...], preferred_element_type=jnp.float32) \
        + rowvec_ref[2:3, :Cmid]          # [S, Cmid]
    v = jnp.dot(h, wv_ref[...], preferred_element_type=jnp.float32) \
        + rowvec_ref[3:4, :Cmid]          # [S, Cmid]

    # ---- 1x1 conv-in as matmul (transposed) + (conv bias + timestep channel bias) ----
    feat_t = jnp.dot(wcin_t_ref[...], x_t, preferred_element_type=jnp.float32)  # [Cmid, HW]
    feat_t = feat_t + colvec_ref[0:Cmid, 0:1]

    # ---- cross-attention (queries = spatial tokens, keys/values = text states) ----
    # 1/sqrt(d_head) is pre-folded into wq_t.
    q_t = jnp.dot(wq_t_ref[...], feat_t, preferred_element_type=jnp.float32)    # [Cmid, HW]
    scores_t = jnp.dot(k, q_t, preferred_element_type=jnp.float32)              # [S, HW]
    m = jnp.max(scores_t, axis=0, keepdims=True)                                # [1, HW]
    p = jnp.exp(scores_t - m)
    p = p * pl.reciprocal(jnp.sum(p, axis=0, keepdims=True), approx=True)
    # attn^T = V^T @ P^T  (contract the S axis of both)
    attn_t = jax.lax.dot_general(v, p, (((0,), (0,)), ((), ())),
                                 preferred_element_type=jnp.float32)            # [Cmid, HW]
    feat_t = feat_t + jnp.dot(wo_t_ref[...], attn_t, preferred_element_type=jnp.float32)

    # ---- 1x1 conv-out as matmul (transposed) ----
    out_t = jnp.dot(wcout_t_ref[...], feat_t, preferred_element_type=jnp.float32) \
        + colvec_ref[0:Cout, 1:2]                                                # [Cout, HW]
    out_ref[0] = out_t


def fused_unet_forward(sample_chw, enc, row_vecs, col_vecs, fp):
    """sample_chw: [B, Cin, HW] (NCHW with spatial flattened — no transpose needed)."""
    B, Cin, HW = sample_chw.shape
    _, S, D = enc.shape
    Cmid = fp["w_cin_t"].shape[0]
    Cout = fp["w_cout_t"].shape[0]

    def full(arr):
        return pl.BlockSpec(arr.shape, lambda b, _shape=arr.shape: tuple(0 for _ in _shape))

    return pl.pallas_call(
        _fused_kernel,
        out_shape=jax.ShapeDtypeStruct((B, Cout, HW), jnp.float32),
        grid_spec=pltpu.PrefetchScalarGridSpec(
            num_scalar_prefetch=0,
            grid=(B,),
            in_specs=[
                pl.BlockSpec((1, Cin, HW), lambda b: (b, 0, 0)),   # sample (NCHW, flat HW)
                pl.BlockSpec((1, S, D), lambda b: (b, 0, 0)),      # encoder hidden states
                full(row_vecs),                                    # packed row vectors
                full(col_vecs),                                    # packed column biases
                full(fp["w_cin_t"]),
                full(fp["w_q_t_scaled"]),
                full(fp["w_k_fused"]),
                full(fp["w_v_fused"]),
                full(fp["w_o_t"]),
                full(fp["w_cout_t"]),
            ],
            out_specs=pl.BlockSpec((1, Cout, HW), lambda b: (b, 0, 0)),
        ),
        compiler_params=pltpu.CompilerParams(dimension_semantics=("parallel",)),
    )(sample_chw, enc, row_vecs, col_vecs,
      fp["w_cin_t"], fp["w_q_t_scaled"], fp["w_k_fused"], fp["w_v_fused"],
      fp["w_o_t"], fp["w_cout_t"])


# ----------------------------------------------------------------------------
# Glue: timestep embedding + parameter setup + ELLAProxyUNet forward
# ----------------------------------------------------------------------------
def sinusoidal_timestep_embedding(timestep, dim):
    half = dim // 2
    freqs = jnp.exp(-math.log(10000.0) * jnp.arange(half, dtype=jnp.float32) / half)
    args = jnp.asarray(timestep, jnp.float32) * freqs
    return jnp.concatenate([jnp.cos(args), jnp.sin(args)], axis=-1)  # [dim]


def init_params(key, d_text, t_sin_dim, t_emb_dim, c_in, c_mid, c_out):
    ks = jax.random.split(key, 16)
    s = 0.05
    p = {
        # ELLA timestep MLP + AdaLN + projection
        "w_t1": jax.random.normal(ks[0], (t_sin_dim, t_emb_dim), jnp.float32) * s,
        "b_t1": jnp.zeros((t_emb_dim,), jnp.float32),
        "w_t2": jax.random.normal(ks[1], (t_emb_dim, t_emb_dim), jnp.float32) * s,
        "b_t2": jnp.zeros((t_emb_dim,), jnp.float32),
        "w_ada": jax.random.normal(ks[2], (t_emb_dim, 2 * d_text), jnp.float32) * s,
        "b_ada": jnp.zeros((2 * d_text,), jnp.float32),
        "w_ella_out": jax.random.normal(ks[3], (d_text, d_text), jnp.float32) * s,
        "b_ella_out": jnp.zeros((1, d_text), jnp.float32),
        # UNet timestep-to-channel bias
        "w_tch": jax.random.normal(ks[4], (t_emb_dim, c_mid), jnp.float32) * s,
        "b_tch": jnp.zeros((c_mid,), jnp.float32),
        # UNet conv / attention weights
        "w_conv_in": jax.random.normal(ks[5], (c_in, c_mid), jnp.float32) * s,
        "b_conv_in": jnp.zeros((1, c_mid), jnp.float32),
        "w_q": jax.random.normal(ks[6], (c_mid, c_mid), jnp.float32) * s,
        "w_k": jax.random.normal(ks[7], (d_text, c_mid), jnp.float32) * s,
        "w_v": jax.random.normal(ks[8], (d_text, c_mid), jnp.float32) * s,
        "w_o": jax.random.normal(ks[9], (c_mid, c_mid), jnp.float32) * s,
        "w_conv_out": jax.random.normal(ks[10], (c_mid, c_out), jnp.float32) * s,
        "b_conv_out": jnp.zeros((1, c_out), jnp.float32),
    }
    return p


def prepare_fused_params(params):
    """One-time (timestep-independent) algebraic fusion + transposed weight layout."""
    c_mid = params["w_conv_in"].shape[1]
    inv_sqrt_d = 1.0 / math.sqrt(float(c_mid))
    fp = dict(params)
    fp.update({
        # ELLA output projection folded into the cross-attention K/V weights.
        "w_k_fused": params["w_ella_out"] @ params["w_k"],                    # [D, Cmid]
        "w_v_fused": params["w_ella_out"] @ params["w_v"],                    # [D, Cmid]
        "b_k_fused": (params["b_ella_out"] @ params["w_k"]).reshape(-1),      # [Cmid]
        "b_v_fused": (params["b_ella_out"] @ params["w_v"]).reshape(-1),      # [Cmid]
        # Transposed weights for the channels-on-sublane / HW-on-lane layout.
        "w_cin_t": params["w_conv_in"].T,                                     # [Cmid, Cin]
        "w_q_t_scaled": params["w_q"].T * inv_sqrt_d,                         # [Cmid, Cmid]
        "w_o_t": params["w_o"].T,                                             # [Cmid, Cmid]
        "w_cout_t": params["w_conv_out"].T,                                   # [Cout, Cmid]
    })
    return fp


def _pad1d(v, n):
    return jnp.pad(v, (0, n - v.shape[0]))


@partial(jax.jit, static_argnames=())
def ella_proxy_unet_forward(sample, timestep, encoder_hidden_states, fparams):
    """sample: [B, C, H, W] (NCHW, like PyTorch); encoder_hidden_states: [B, S, D]."""
    B, C, H, W = sample.shape
    _, S, D = encoder_hidden_states.shape
    t_sin_dim = fparams["w_t1"].shape[0]
    Cmid = fparams["w_cin_t"].shape[0]
    Cout = fparams["w_cout_t"].shape[0]

    # --- timestep embedding (tiny scalar work; plain XLA glue, computed once per call) ---
    t_sin = sinusoidal_timestep_embedding(timestep, t_sin_dim)
    t_h = jax.nn.silu(t_sin @ fparams["w_t1"] + fparams["b_t1"])
    t_emb = jax.nn.silu(t_h @ fparams["w_t2"] + fparams["b_t2"])

    ada = t_emb @ fparams["w_ada"] + fparams["b_ada"]                   # [2*D]
    scale, shift = ada[:D], ada[D:]
    t_bias = t_emb @ fparams["w_tch"] + fparams["b_tch"]                # [Cmid]
    bias_cin_total = fparams["b_conv_in"].reshape(-1) + t_bias          # [Cmid]

    # --- pack the tiny per-call vectors into two arrays (fewer DMAs per grid step) ---
    RW = max(D, Cmid)
    zr = jnp.zeros((RW,), jnp.float32)
    row_vecs = jnp.stack([
        _pad1d(scale, RW), _pad1d(shift, RW),
        _pad1d(fparams["b_k_fused"], RW), _pad1d(fparams["b_v_fused"], RW),
        zr, zr, zr, zr,
    ], axis=0)                                                          # [8, RW]

    CM = max(Cmid, Cout)
    zc = jnp.zeros((CM,), jnp.float32)
    col_vecs = jnp.stack([
        _pad1d(bias_cin_total, CM),
        _pad1d(fparams["b_conv_out"].reshape(-1), CM),
        zc, zc, zc, zc, zc, zc,
    ], axis=1)                                                          # [CM, 8]

    # --- fused ELLA + UNet kernel; NCHW consumed directly (reshape only, no transpose) ---
    sample_chw = sample.reshape(B, C, H * W)
    out_chw = fused_unet_forward(sample_chw, encoder_hidden_states,
                                 row_vecs, col_vecs, fparams)           # [B, Cout, HW]
    return out_chw.reshape(B, Cout, H, W)


# Pure-JAX reference of the same (unfused) ELLA -> UNet math, for a correctness check.
def reference_forward(sample, timestep, enc, params):
    B, C, H, W = sample.shape
    _, S, D = enc.shape
    t_sin = sinusoidal_timestep_embedding(timestep, params["w_t1"].shape[0])
    t_h = jax.nn.silu(t_sin @ params["w_t1"] + params["b_t1"])
    t_emb = jax.nn.silu(t_h @ params["w_t2"] + params["b_t2"])
    ada = t_emb @ params["w_ada"] + params["b_ada"]
    scale, shift = ada[:D][None, None, :], ada[D:][None, None, :]
    mean = jnp.mean(enc, axis=-1, keepdims=True)
    var = jnp.mean((enc - mean) ** 2, axis=-1, keepdims=True)
    enc_hat = (enc - mean) * jax.lax.rsqrt(var + 1e-6)
    time_aware = (enc_hat * (1.0 + scale) + shift) @ params["w_ella_out"] + params["b_ella_out"]
    t_bias = t_emb @ params["w_tch"] + params["b_tch"]
    x = jnp.transpose(sample, (0, 2, 3, 1)).reshape(B, H * W, C)
    feat = x @ params["w_conv_in"] + params["b_conv_in"] + t_bias[None, None, :]
    q = feat @ params["w_q"]
    k = time_aware @ params["w_k"]
    v = time_aware @ params["w_v"]
    scores = jnp.einsum("bqd,bkd->bqk", q, k) / jnp.sqrt(jnp.float32(q.shape[-1]))
    p = jax.nn.softmax(scores, axis=-1)
    attn = jnp.einsum("bqk,bkd->bqd", p, v)
    feat = feat + attn @ params["w_o"]
    out = feat @ params["w_conv_out"] + params["b_conv_out"]
    Cout = out.shape[-1]
    return jnp.transpose(out.reshape(B, H, W, Cout), (0, 3, 1, 2))


# TODO(synk): the real ELLA (perceiver resampler) and full diffusers UNet2DConditionModel
# have many more blocks (and the flexible_max_length_workaround ragged path); this script
# implements representative timestep-modulated conditioning + cross-attention UNet hot
# paths as a single fused Pallas kernel.

if __name__ == "__main__":
    B, C, H, W = 2, 4, 16, 16
    S, D = 8, 32
    T_SIN, T_EMB = 32, 64
    C_MID = 32

    key = jax.random.PRNGKey(0)
    k_sample, k_enc, k_params = jax.random.split(key, 3)

    sample = jax.random.normal(k_sample, (B, C, H, W), jnp.float32)
    encoder_hidden_states = jax.random.normal(k_enc, (B, S, D), jnp.float32)
    timestep = jnp.float32(10.0)

    params = init_params(k_params, d_text=D, t_sin_dim=T_SIN, t_emb_dim=T_EMB,
                         c_in=C, c_mid=C_MID, c_out=C)
    fused_params = prepare_fused_params(params)

    out = ella_proxy_unet_forward(sample, timestep, encoder_hidden_states, fused_params)
    out = jax.block_until_ready(out)
    assert out.shape == (B, C, H, W) and out.dtype == jnp.float32

    ref = reference_forward(sample, timestep, encoder_hidden_states, params)
    assert jnp.allclose(out, ref, rtol=5e-3, atol=5e-3), "mismatch vs unfused reference"

    print("KERNEL_OK")
</pallas_src>

<mosaic_0001>
module attributes {stable_mosaic.version = 11 : i64} {
  func.func @_fused_kernel(%arg0: i32, %arg1: memref<1x4x256xf32, #tpu.memory_space<vmem>>, %arg2: memref<1x8x32xf32, #tpu.memory_space<vmem>>, %arg3: memref<8x32xf32, #tpu.memory_space<vmem>>, %arg4: memref<32x8xf32, #tpu.memory_space<vmem>>, %arg5: memref<32x4xf32, #tpu.memory_space<vmem>>, %arg6: memref<32x32xf32, #tpu.memory_space<vmem>>, %arg7: memref<32x32xf32, #tpu.memory_space<vmem>>, %arg8: memref<32x32xf32, #tpu.memory_space<vmem>>, %arg9: memref<32x32xf32, #tpu.memory_space<vmem>>, %arg10: memref<4x32xf32, #tpu.memory_space<vmem>>, %arg11: memref<1x4x256xf32, #tpu.memory_space<vmem>>) attributes {dimension_semantics = [#tpu.dimension_semantics<parallel>], iteration_bounds = array<i64: 2>, scalar_prefetch = 0 : i64, scratch_operands = 0 : i64, tpu.core_type = #tpu.core_type<tc>, window_params = [{transform_indices = @transform_0, window_bounds = array<i64: 1, 4, 256>}, {transform_indices = @transform_1, window_bounds = array<i64: 1, 8, 32>}, {pipeline_mode = #tpu.pipeline_mode<synchronous>, transform_indices = @transform_2, window_bounds = array<i64: 8, 32>}, {pipeline_mode = #tpu.pipeline_mode<synchronous>, transform_indices = @transform_3, window_bounds = array<i64: 32, 8>}, {pipeline_mode = #tpu.pipeline_mode<synchronous>, transform_indices = @transform_4, window_bounds = array<i64: 32, 4>}, {pipeline_mode = #tpu.pipeline_mode<synchronous>, transform_indices = @transform_5, window_bounds = array<i64: 32, 32>}, {pipeline_mode = #tpu.pipeline_mode<synchronous>, transform_indices = @transform_6, window_bounds = array<i64: 32, 32>}, {pipeline_mode = #tpu.pipeline_mode<synchronous>, transform_indices = @transform_7, window_bounds = array<i64: 32, 32>}, {pipeline_mode = #tpu.pipeline_mode<synchronous>, transform_indices = @transform_8, window_bounds = array<i64: 32, 32>}, {pipeline_mode = #tpu.pipeline_mode<synchronous>, transform_indices = @transform_9, window_bounds = array<i64: 4, 32>}, {transform_indices = @transform_10, window_bounds = array<i64: 1, 4, 256>}]} {
    %c0 = arith.constant 0 : index
    %c0_0 = arith.constant 0 : index
    %c0_1 = arith.constant 0 : index
    %0 = vector.load %arg1[%c0, %c0_0, %c0_1] : memref<1x4x256xf32, #tpu.memory_space<vmem>>, vector<1x4x256xf32>
    %1 = vector.shape_cast %0 : vector<1x4x256xf32> to vector<4x256xf32>
    %c0_2 = arith.constant 0 : index
    %c0_3 = arith.constant 0 : index
    %c0_4 = arith.constant 0 : index
    %2 = vector.load %arg2[%c0_2, %c0_3, %c0_4] : memref<1x8x32xf32, #tpu.memory_space<vmem>>, vector<1x8x32xf32>
    %3 = vector.shape_cast %2 : vector<1x8x32xf32> to vector<8x32xf32>
    %cst = arith.constant dense<0.000000e+00> : vector<8xf32>
    %4 = vector.multi_reduction <add>, %3, %cst [1] : vector<8x32xf32> to vector<8xf32>
    %5 = vector.shape_cast %4 : vector<8xf32> to vector<8x1xf32>
    %cst_5 = arith.constant 3.200000e+01 : f32
    %6 = vector.broadcast %cst_5 : f32 to vector<8x1xf32>
    %7 = arith.divf %5, %6 : vector<8x1xf32>
    %8 = vector.broadcast %7 : vector<8x1xf32> to vector<8x32xf32>
    %9 = arith.subf %3, %8 : vector<8x32xf32>
    %10 = arith.mulf %9, %9 : vector<8x32xf32>
    %cst_6 = arith.constant dense<0.000000e+00> : vector<8xf32>
    %11 = vector.multi_reduction <add>, %10, %cst_6 [1] : vector<8x32xf32> to vector<8xf32>
    %12 = vector.shape_cast %11 : vector<8xf32> to vector<8x1xf32>
    %cst_7 = arith.constant 3.200000e+01 : f32
    %13 = vector.broadcast %cst_7 : f32 to vector<8x1xf32>
    %14 = arith.divf %12, %13 : vector<8x1xf32>
    %15 = vector.broadcast %7 : vector<8x1xf32> to vector<8x32xf32>
    %16 = arith.subf %3, %15 : vector<8x32xf32>
    %cst_8 = arith.constant 9.99999997E-7 : f32
    %17 = vector.broadcast %cst_8 : f32 to vector<8x1xf32>
    %18 = arith.addf %14, %17 : vector<8x1xf32>
    %19 = math.rsqrt %18 : vector<8x1xf32>
    %20 = vector.broadcast %19 : vector<8x1xf32> to vector<8x32xf32>
    %21 = arith.mulf %16, %20 : vector<8x32xf32>
    %c0_9 = arith.constant 0 : index
    %c0_10 = arith.constant 0 : index
    %22 = vector.load %arg3[%c0_9, %c0_10] : memref<8x32xf32, #tpu.memory_space<vmem>>, vector<1x32xf32>
    %c1 = arith.constant 1 : index
    %c0_11 = arith.constant 0 : index
    %23 = vector.load %arg3[%c1, %c0_11] : memref<8x32xf32, #tpu.memory_space<vmem>>, vector<1x32xf32>
    %cst_12 = arith.constant 1.000000e+00 : f32
    %24 = vector.broadcast %cst_12 : f32 to vector<1x32xf32>
    %25 = arith.addf %24, %22 : vector<1x32xf32>
    %26 = vector.broadcast %25 : vector<1x32xf32> to vector<8x32xf32>
    %27 = arith.mulf %21, %26 : vector<8x32xf32>
    %28 = vector.broadcast %23 : vector<1x32xf32> to vector<8x32xf32>
    %29 = arith.addf %27, %28 : vector<8x32xf32>
    %c0_13 = arith.constant 0 : index
    %c0_14 = arith.constant 0 : index
    %30 = vector.load %arg7[%c0_13, %c0_14] : memref<32x32xf32, #tpu.memory_space<vmem>>, vector<32x32xf32>
    %cst_15 = arith.constant dense<0.000000e+00> : vector<8x32xf32>
    %31 = tpu.matmul %29, %30, %cst_15 {dimension_numbers = #tpu.dot_dimension_numbers<[1], [0], [0], [1], [0, 0, 1, 1], [], []>} : vector<8x32xf32>, vector<32x32xf32>, vector<8x32xf32> -> vector<8x32xf32>
    %c2 = arith.constant 2 : index
    %c0_16 = arith.constant 0 : index
    %32 = vector.load %arg3[%c2, %c0_16] : memref<8x32xf32, #tpu.memory_space<vmem>>, vector<1x32xf32>
    %33 = vector.broadcast %32 : vector<1x32xf32> to vector<8x32xf32>
    %34 = arith.addf %31, %33 : vector<8x32xf32>
    %c0_17 = arith.constant 0 : index
    %c0_18 = arith.constant 0 : index
    %35 = vector.load %arg8[%c0_17, %c0_18] : memref<32x32xf32, #tpu.memory_space<vmem>>, vector<32x32xf32>
    %cst_19 = arith.constant dense<0.000000e+00> : vector<8x32xf32>
    %36 = tpu.matmul %29, %35, %cst_19 {dimension_numbers = #tpu.dot_dimension_numbers<[1], [0], [0], [1], [0, 0, 1, 1], [], []>} : vector<8x32xf32>, vector<32x32xf32>, vector<8x32xf32> -> vector<8x32xf32>
    %c3 = arith.constant 3 : index
    %c0_20 = arith.constant 0 : index
    %37 = vector.load %arg3[%c3, %c0_20] : memref<8x32xf32, #tpu.memory_space<vmem>>, vector<1x32xf32>
    %38 = vector.broadcast %37 : vector<1x32xf32> to vector<8x32xf32>
    %39 = arith.addf %36, %38 : vector<8x32xf32>
    %c0_21 = arith.constant 0 : index
    %c0_22 = arith.constant 0 : index
    %40 = vector.load %arg5[%c0_21, %c0_22] : memref<32x4xf32, #tpu.memory_space<vmem>>, vector<32x4xf32>
    %cst_23 = arith.constant dense<0.000000e+00> : vector<32x256xf32>
    %41 = tpu.matmul %40, %1, %cst_23 {dimension_numbers = #tpu.dot_dimension_numbers<[1], [0], [0], [1], [0, 0, 1, 1], [], []>} : vector<32x4xf32>, vector<4x256xf32>, vector<32x256xf32> -> vector<32x256xf32>
    %c0_24 = arith.constant 0 : index
    %c0_25 = arith.constant 0 : index
    %42 = vector.load %arg4[%c0_24, %c0_25] : memref<32x8xf32, #tpu.memory_space<vmem>>, vector<32x1xf32>
    %43 = vector.broadcast %42 : vector<32x1xf32> to vector<32x256xf32>
    %44 = arith.addf %41, %43 : vector<32x256xf32>
    %c0_26 = arith.constant 0 : index
    %c0_27 = arith.constant 0 : index
    %45 = vector.load %arg6[%c0_26, %c0_27] : memref<32x32xf32, #tpu.memory_space<vmem>>, vector<32x32xf32>
    %cst_28 = arith.constant dense<0.000000e+00> : vector<32x256xf32>
    %46 = tpu.matmul %45, %44, %cst_28 {dimension_numbers = #tpu.dot_dimension_numbers<[1], [0], [0], [1], [0, 0, 1, 1], [], []>} : vector<32x32xf32>, vector<32x256xf32>, vector<32x256xf32> -> vector<32x256xf32>
    %cst_29 = arith.constant dense<0.000000e+00> : vector<8x256xf32>
    %47 = tpu.matmul %34, %46, %cst_29 {dimension_numbers = #tpu.dot_dimension_numbers<[1], [0], [0], [1], [0, 0, 1, 1], [], []>} : vector<8x32xf32>, vector<32x256xf32>, vector<8x256xf32> -> vector<8x256xf32>
    %cst_30 = arith.constant dense<0xFF800000> : vector<256xf32>
    %48 = vector.multi_reduction <maximumf>, %47, %cst_30 [0] : vector<8x256xf32> to vector<256xf32>
    %49 = vector.shape_cast %48 : vector<256xf32> to vector<1x256xf32>
    %50 = vector.broadcast %49 : vector<1x256xf32> to vector<8x256xf32>
    %51 = arith.subf %47, %50 : vector<8x256xf32>
    %52 = math.exp %51 : vector<8x256xf32>
    %cst_31 = arith.constant dense<0.000000e+00> : vector<256xf32>
    %53 = vector.multi_reduction <add>, %52, %cst_31 [0] : vector<8x256xf32> to vector<256xf32>
    %54 = vector.shape_cast %53 : vector<256xf32> to vector<1x256xf32>
    %55 = tpu.reciprocal %54 {approx = true} : vector<1x256xf32> -> vector<1x256xf32>
    %56 = vector.broadcast %55 : vector<1x256xf32> to vector<8x256xf32>
    %57 = arith.mulf %52, %56 : vector<8x256xf32>
    %cst_32 = arith.constant dense<0.000000e+00> : vector<32x256xf32>
    %58 = tpu.matmul %39, %57, %cst_32 {dimension_numbers = #tpu.dot_dimension_numbers<[0], [0], [1], [1], [0, 1, 1, 1], [], []>} : vector<8x32xf32>, vector<8x256xf32>, vector<32x256xf32> -> vector<32x256xf32>
    %c0_33 = arith.constant 0 : index
    %c0_34 = arith.constant 0 : index
    %59 = vector.load %arg9[%c0_33, %c0_34] : memref<32x32xf32, #tpu.memory_space<vmem>>, vector<32x32xf32>
    %cst_35 = arith.constant dense<0.000000e+00> : vector<32x256xf32>
    %60 = tpu.matmul %59, %58, %cst_35 {dimension_numbers = #tpu.dot_dimension_numbers<[1], [0], [0], [1], [0, 0, 1, 1], [], []>} : vector<32x32xf32>, vector<32x256xf32>, vector<32x256xf32> -> vector<32x256xf32>
    %61 = arith.addf %44, %60 : vector<32x256xf32>
    %c0_36 = arith.constant 0 : index
    %c0_37 = arith.constant 0 : index
    %62 = vector.load %arg10[%c0_36, %c0_37] : memref<4x32xf32, #tpu.memory_space<vmem>>, vector<4x32xf32>
    %cst_38 = arith.constant dense<0.000000e+00> : vector<4x256xf32>
    %63 = tpu.matmul %62, %61, %cst_38 {dimension_numbers = #tpu.dot_dimension_numbers<[1], [0], [0], [1], [0, 0, 1, 1], [], []>} : vector<4x32xf32>, vector<32x256xf32>, vector<4x256xf32> -> vector<4x256xf32>
    %c0_39 = arith.constant 0 : index
    %c1_40 = arith.constant 1 : index
    %64 = vector.load %arg4[%c0_39, %c1_40] : memref<32x8xf32, #tpu.memory_space<vmem>>, vector<4x1xf32>
    %65 = vector.broadcast %64 : vector<4x1xf32> to vector<4x256xf32>
    %66 = arith.addf %63, %65 : vector<4x256xf32>
    %c0_41 = arith.constant 0 : index
    %c0_42 = arith.constant 0 : index
    %c0_43 = arith.constant 0 : index
    %67 = vector.load %arg11[%c0_41, %c0_42, %c0_43] : memref<1x4x256xf32, #tpu.memory_space<vmem>>, vector<1x4x256xf32>
    %68 = vector.shape_cast %67 : vector<1x4x256xf32> to vector<4x256xf32>
    %69 = vector.shape_cast %66 : vector<4x256xf32> to vector<1x4x256xf32>
    tpu.vector_store %arg11[%c0_41, %c0_42, %c0_43], %69 {strides = array<i32>} : memref<1x4x256xf32, #tpu.memory_space<vmem>>, vector<1x4x256xf32>,
    return
  }
  func.func @transform_0(%arg0: i32) -> (i32, i32, i32) {
    %c0_i32 = arith.constant 0 : i32
    %c0_i32_0 = arith.constant 0 : i32
    %c0_i32_1 = arith.constant 0 : i32
    return %arg0, %c0_i32, %c0_i32_0 : i32, i32, i32
  }
  func.func @transform_1(%arg0: i32) -> (i32, i32, i32) {
    %c0_i32 = arith.constant 0 : i32
    %c0_i32_0 = arith.constant 0 : i32
    %c0_i32_1 = arith.constant 0 : i32
    return %arg0, %c0_i32, %c0_i32_0 : i32, i32, i32
  }
  func.func @transform_2(%arg0: i32) -> (i32, i32) {
    %c0_i32 = arith.constant 0 : i32
    %c0_i32_0 = arith.constant 0 : i32
    %c0_i32_1 = arith.constant 0 : i32
    return %c0_i32, %c0_i32_0 : i32, i32
  }
  func.func @transform_3(%arg0: i32) -> (i32, i32) {
    %c0_i32 = arith.constant 0 : i32
    %c0_i32_0 = arith.constant 0 : i32
    %c0_i32_1 = arith.constant 0 : i32
    return %c0_i32, %c0_i32_0 : i32, i32
  }
  func.func @transform_4(%arg0: i32) -> (i32, i32) {
    %c0_i32 = arith.constant 0 : i32
    %c0_i32_0 = arith.constant 0 : i32
    %c0_i32_1 = arith.constant 0 : i32
    return %c0_i32, %c0_i32_0 : i32, i32
  }
  func.func @transform_5(%arg0: i32) -> (i32, i32) {
    %c0_i32 = arith.constant 0 : i32
    %c0_i32_0 = arith.constant 0 : i32
    %c0_i32_1 = arith.constant 0 : i32
    return %c0_i32, %c0_i32_0 : i32, i32
  }
  func.func @transform_6(%arg0: i32) -> (i32, i32) {
    %c0_i32 = arith.constant 0 : i32
    %c0_i32_0 = arith.constant 0 : i32
    %c0_i32_1 = arith.constant 0 : i32
    return %c0_i32, %c0_i32_0 : i32, i32
  }
  func.func @transform_7(%arg0: i32) -> (i32, i32) {
    %c0_i32 = arith.constant 0 : i32
    %c0_i32_0 = arith.constant 0 : i32
    %c0_i32_1 = arith.constant 0 : i32
    return %c0_i32, %c0_i32_0 : i32, i32
  }
  func.func @transform_8(%arg0: i32) -> (i32, i32) {
    %c0_i32 = arith.constant 0 : i32
    %c0_i32_0 = arith.constant 0 : i32
    %c0_i32_1 = arith.constant 0 : i32
    return %c0_i32, %c0_i32_0 : i32, i32
  }
  func.func @transform_9(%arg0: i32) -> (i32, i32) {
    %c0_i32 = arith.constant 0 : i32
    %c0_i32_0 = arith.constant 0 : i32
    %c0_i32_1 = arith.constant 0 : i32
    return %c0_i32, %c0_i32_0 : i32, i32
  }
  func.func @transform_10(%arg0: i32) -> (i32, i32, i32) {
    %c0_i32 = arith.constant 0 : i32
    %c0_i32_0 = arith.constant 0 : i32
    %c0_i32_1 = arith.constant 0 : i32
    return %arg0, %c0_i32, %c0_i32_0 : i32, i32, i32
  }
}

</mosaic_0001>

<bundles_post_ra>
// kernel: ella_proxy_unet_forward.1
= control target key start
LH: loop header
LB: loop body
LE: loop exit
PB: predicated region body
PF: predicated region fallthrough
CT: control target
= control target key end

     0   :  { %s1528_s13 = smov 0   ;;  %s1714_s0 = inlined_call_operand.vmem [shape: f32[2,4,256], index: 0, kind: input, shape index: {}]   ;;  %s1715_s1 = inlined_call_operand.vmem [shape: f32[2,8,32], index: 1, kind: input, shape index: {}]   ;;  %s1716_s2 = inlined_call_operand.vmem [shape: f32[8,32], index: 2, kind: input, shape index: {}]   ;;  %s1717_s3 = inlined_call_operand.vmem [shape: f32[32,8], index: 3, kind: input, shape index: {}]   ;;  %s1718_s4 = inlined_call_operand.vmem [shape: f32[32,4], index: 4, kind: input, shape index: {}]   ;;  %s1719_s5 = inlined_call_operand.vmem [shape: f32[32,32], index: 5, kind: input, shape index: {}]   ;;  %s1720_s6 = inlined_call_operand.vmem [shape: f32[32,32], index: 6, kind: input, shape index: {}]   ;;  %s1721_s7 = inlined_call_operand.vmem [shape: f32[32,32], index: 7, kind: input, shape index: {}]   ;;  %s1722_s8 = inlined_call_operand.vmem [shape: f32[32,32], index: 8, kind: input, shape index: {}]   ;;  %s1723_s9 = inlined_call_operand.vmem [shape: f32[4,32], index: 9, kind: input, shape index: {}]   ;;  %s1724_s10 = inlined_call_operand.vmem [shape: f32[2,4,256], index: 10, kind: output, shape index: {}]  }
   0x1 LB: > { %s1318_s14 = sadd.s32 4294967295, %s1466_s13   ;;  %p1322_p0 = scmp.ge.s32.totalorder %s1466_s13, 1  ;;  %s1466_s13 = sphi %s1528_s13, %s20_s13  }
   0x2   : > { %p321_p1 = scmp.lt.s32.totalorder %s1466_s13, 3 }
   0x4   : > { %p322_p2 = pnand %p1322_p0, %p321_p1 }
   0x5   : > { %p363_p3 = scmp.lt.s32.totalorder (!%p322_p2), %s1318_s14, 1  ;;  %vm379_vm0 = vcmask (!%p322_p2), 261120   ;;  %v407_v7 = vld [vmem:[%s1720_s6] sm:$0xff] (!%p322_p2)  ;;  %v408_v8 = vld [vmem:[%s1720_s6 + $0x8] sm:$0xff] (!%p322_p2)  ;;  %v1468_v10 = vmov (!%p322_p2), 0.0|0.0   ;;  %v409_v13 = vld [vmem:[%s1720_s6 + $0x10] sm:$0xff] (!%p322_p2)  ;;  %v397_v30 = vlaneseq (!%p322_p2) }
   0x6   : > { %325 = sbr.rel (%p322_p2) target bundleno = 1747 (0x6d3), region = 60  ;;  %v489_v9 = vld [vmem:[%s1721_s7] sm:$0xff] (!%p322_p2)  ;;  %1389 = vmatprep.subr.bf16.mxu0 (!%p322_p2), %v1468_v10  ;;  %1395 = vmatprep.subr.bf16.mxu1 (!%p322_p2), %v1468_v10  ;;  %v1390_v11 = vpack.c.bf16 (!%p322_p2), %v408_v8, %v407_v7  ;;  %v490_v12 = vld [vmem:[%s1721_s7 + $0x8] sm:$0xff] (!%p322_p2)  ;;  %v410_v14 = vld [vmem:[%s1720_s6 + $0x18] sm:$0xff] (!%p322_p2)  ;;  %vm1469_vm1 = vmmov (!%p322_p2), 0   ;;  %v1470_v18 = vmov (!%p322_p2), 0.0  }
   0x7   : > { %v1396_v15 = vpack.c.bf16 (!%p322_p2), %v490_v12, %v489_v9  ;;  %v491_v16 = vld [vmem:[%s1721_s7 + $0x10] sm:$0xff] (!%p322_p2)  ;;  %v492_v17 = vld [vmem:[%s1721_s7 + $0x18] sm:$0xff] (!%p322_p2)  ;;  %1375 = vmatprep.mubr.msk.f32.mxu0 (!%p322_p2), %vm1469_vm1, %v1470_v18  ;;  %1386 = vmatprep.mubr.msk.f32.mxu1 (!%p322_p2), %vm1469_vm1, %v1470_v18  ;;  %v1393_v19 = vpack.c.bf16 (!%p322_p2), %v410_v14, %v409_v13  ;;  %vm611_vm2 = vcmask (!%p322_p2), 1043456   ;;  %v572_v23 = vld [vmem:[%s1717_s3] sm:$0xff] (!%p322_p2)  ;;  %v1471_v24 = vmov (!%p322_p2), 0  }
   0x8   : > { %1391 = vmatpush3.bf16.msra.mxu0 (!%p322_p2), %v1390_v11  ;;  %v1399_v20 = vpack.c.bf16 (!%p322_p2), %v492_v17, %v491_v16  ;;  %1446 = vset.pattern.permute.xlu1 (!%p322_p2), %v1471_v24  ;;  %v574_v25 = vld [vmem:[%s1717_s3 + $0x10] sm:$0xff] (!%p322_p2)  ;;  %v573_v26 = vld [vmem:[%s1717_s3 + $0x8] sm:$0xff] (!%p322_p2)  ;;  %v575_v27 = vld [vmem:[%s1717_s3 + $0x18] sm:$0xff] (!%p322_p2)  ;;  %v398_v32 = vshrl.u32 (!%p322_p2), %v397_v30, 7  ;;  %vm598_vm3 = vcmask (!%p322_p2), 31744   ;;  %vm950_vm4 = vcmask (!%p322_p2), 64512  }
   0x9   : > { %1397 = vmatpush3.bf16.msra.mxu1 (!%p322_p2), %v1396_v15  ;;  %1392 = vmatprep.subr.bf16.mxu0 (!%p322_p2), %v1468_v10  ;;  %v394_v33 = vld [vmem:[%s1716_s2] sm:$0x1] (!%p322_p2)  ;;  %v1328_v39 = vld [vmem:[%s1716_s2 + $0x1] ss:$0 sm:$0xff] (!%p322_p2)  ;;  %v569_v43 = vld [vmem:[%s1718_s4 + $0x8] sm:$0xff] (!%p322_p2) }
   0xa   : > { %1398 = vmatprep.subr.bf16.mxu1 (!%p322_p2), %v1468_v10  ;;  %1447 = vset.pattern.permute.xlu0 (!%p322_p2), %v1471_v24  ;;  %v396_v34 = vadd.f32 (!%p322_p2), 1.0, %v394_v33  ;;  %v399_v35 = vsub.s32 (!%p322_p2), 0, %v398_v32  ;;  %v568_v42 = vld [vmem:[%s1718_s4] sm:$0xff] (!%p322_p2)  ;;  %v570_v44 = vld [vmem:[%s1718_s4 + $0x10] sm:$0xff] (!%p322_p2)  ;;  %v571_v45 = vld [vmem:[%s1718_s4 + $0x18] sm:$0xff] (!%p322_p2) }
   0xb   : > { %578 = vperm.xlu1 (!%p322_p2), %1446, %v572_v23   ;;  %v1331_v46 = vld [vmem:[%s1716_s2 + $0x3] ss:$0 sm:$0xff] (!%p322_p2)  ;;  %v706_v13 = vld [vmem:[%s1719_s5 + $0x8] sm:$0xff] (!%p322_p2)  ;;  %v707_v14 = vld [vmem:[%s1719_s5 + $0x10] sm:$0xff] (!%p322_p2) }
   0xc   : > { %1394 = vmatpush3.bf16.msra.mxu0 (!%p322_p2), %v1393_v19  ;;  %v400_v36 = vrot.slane (!%p322_p2), %v396_v34, %v399_v35  ;;  %v705_v12 = vld [vmem:[%s1719_s5] sm:$0xff] (!%p322_p2)  ;;  %v708_v15 = vld [vmem:[%s1719_s5 + $0x18] sm:$0xff] (!%p322_p2) }
   0xd   : > { %s1726_s14 = smov (!%p363_p3, %s1318_s14), 1  ;;  %1400 = vmatpush3.bf16.msra.mxu1 %v1399_v20 }
   0xe   : > { %s1536_s15 = sshll.u32 %s1726_s14, 3 }
   0xf   : > { %s371_s18 = scalar_lea.vmem %s1715_s1, %s1536_s15  ;;  %s367_s19 = scalar_lea.vmem %s1714_s0, %s1536_s15  ;;  %583 = vperm.xlu1 %1446, %v573_v26  }
  0x10   : > { %v378_v0 = vld [vmem:[%s371_s18] sm:$0xff]  ;;  %s376_s30 = scalar_lea.vmem %s1724_s10, %s1536_s15 }
  0x11   : > { %v380_v1 = vsel %vm379_vm0, %v378_v0, 0.0  ;;  %v377_v21 = vld [vmem:[%s367_s19] sm:$0xff] }
  0x12   : > { %381 = vadd.xlane.f32.xlu0 %v380_v1  ;;  %v597_v22 = vcombine.high %v377_v21, %v377_v21 }
  0x13   : > { %593 = vperm.xlu1 %1446, %v575_v27  }
  0x14   : > { %1333 = vmatprep.subr.msk.mxu0 %vm611_vm2, %v597_v22 }
  0x8a   : > { %v579_v52 = vpop.permute.xlu1 %578 }
  0x8e   : > { %v584_v55 = vpop.permute.xlu1 %583 }
  0x9f   : > { %v382_v2 = vpop.xlane.xlu0 %381 }
  0xa0   : > { %v384_v3 = vmul.f32 0.03125, %v382_v2 }
  0xa2   : > { %v385_v4 = vsub.f32 %v378_v0, %v384_v3  ;;  %v594_v3 = vpop.permute.xlu1 %593 }
  0xa4   : > { %v386_v5 = vmul.f32 %v385_v4, %v385_v4 }
  0xa6   : > { %v387_v6 = vsel %vm379_vm0, %v386_v5, 0.0 }
  0xa7   : > { %388 = vadd.xlane.f32.xlu0 %v387_v6 }
  0xbd   : > { %588 = vperm.xlu0 %1447, %v574_v25  }
 0x134   : > { %v389_v28 = vpop.xlane.xlu0 %388 }
 0x135   : > { %v390_v29 = vmul.f32 0.03125, %v389_v28 }
 0x137   : > { %v391_v31 = vadd.f32 1e-06, %v390_v29  ;;  %v1329_v29 = vld [vmem:[%s1716_s2 + $0x2] ss:$0 sm:$0xff] }
 0x139   : > { %1450 = vrsqrt.f32 %v391_v31 }
 0x13c   : > { %v589_v2 = vpop.permute.xlu0 %588 }
 0x143   : > { %v1451_v37 = vpop.eup %1450 }
 0x144   : > { %v393_v38 = vmul.f32 %v1451_v37, %v385_v4 }
 0x146   : > { %v401_v40 = vmul.f32 %v400_v36, %v393_v38 }
 0x148   : > { %v406_v41 = vadd.f32 %v1328_v39, %v401_v40 }
 0x14a   : > { %1376 = vmatmul.mubr.msk.f32.vlgmr.msra.gmra.mrb[0].mxu0 %vm379_vm0, %v406_v41  ;;  %1387 = vmatmul.mubr.msk.f32.vlgmr.msra.gmra.mrb[0].mxu1 %vm379_vm0, %v406_v41 }
 0x14b   : > { %1334 = vmatpush1.msk.msra.mxu0 %vm611_vm2, %v377_v21  ;;  %680 = vmatprep.mubr.f32.mxu0 %v1470_v18 }
 0x14c   : > { %785 = vmatprep.mubr.f32.mxu1 %v1470_v18 }
 0x14e   : > { %1335 = vmatmul.mubr.msk.f32.vlgmr.msra.gmra.mrb[2].mxu0 %vm598_vm3, %v568_v42 }
 0x14f   : > { %686 = vmatprep.mubr.f32.mxu0 %v1470_v18 }
 0x152   : > { %1336 = vmatmul.mubr.msk.f32.gmra.mrb[4].mxu0 %vm598_vm3, %v569_v43 }
 0x153   : > { %692 = vmatprep.mubr.f32.mxu0 %v1470_v18 }
 0x156   : > { %1337 = vmatmul.mubr.msk.f32.gmra.mrb[6].mxu0 %vm598_vm3, %v570_v44 }
 0x157   : > { %698 = vmatprep.mubr.f32.mxu0 %v1470_v18 }
 0x15a   : > { %1338 = vmatmul.mubr.msk.f32.gmra.mrb[8].mxu0 %vm598_vm3, %v571_v45 }
 0x15b   : > { %877 = vmatprep.mubr.f32.mxu0 %v1470_v18 }
 0x21d   : > { %v1617_v47 = vpop.f32.mrb[0].mxu0  ;;  %v564_v48 = vpop.f32.mrb[0].mxu1 }
 0x21e   : > { %v565_v49 = vadd.f32 %v1331_v46, %v564_v48  ;;  %v1377_v50 = vpop.f32.mrb[1].mxu0  ;;  %v1388_v51 = vpop.f32.mrb[1].mxu1  ;;  %v486_v30 = vadd.f32 %v1329_v29, %v1617_v47  ;;  %v1053_v29 = vld [vmem:[%s1722_s8 + $0x8] sm:$0xff] }
 0x220   : > { %918 = vxpose.xlu1.b32.start.end [1/1] (short) (narrow) %v565_v49, 32 }
 0x221   : > { %v682_v53 = vpop.f32.mrb[2].mxu0 }
 0x222   : > { %v684_v54 = vpop.f32.mrb[3].mxu0  ;;  %v1625_v61 = vadd.f32 %v682_v53, %v579_v52 }
 0x223   : > { %v1621_v59 = vadd.f32 %v684_v54, %v579_v52 }
 0x225   : > { %v688_v56 = vpop.f32.mrb[4].mxu0 }
 0x226   : > { %v1619_v57 = vadd.f32 %v688_v56, %v584_v55  ;;  %v690_v58 = vpop.f32.mrb[5].mxu0 }
 0x227   : > { %v1623_v60 = vadd.f32 %v690_v58, %v584_v55 }
 0x228   : > { %v1403_v0 = vpack.c.bf16 %v1619_v57, %v1625_v61 }
 0x229   : > { %v1401_v62 = vpack.c.bf16 %v1623_v60, %v1621_v59  ;;  %v694_v63 = vpop.f32.mrb[6].mxu0 }
 0x22a   : > { %v696_v1 = vpop.f32.mrb[7].mxu0  ;;  %v1637_v9 = vadd.f32 %v694_v63, %v589_v2 }
 0x22b   : > { %1402 = vmatprep.subr.bf16.mxu1 %v1401_v62  ;;  %v1633_v7 = vadd.f32 %v696_v1, %v589_v2 }
 0x22c   : > { %1404 = vmatpush1.bf16.msra.mxu1 %v1403_v0 }
 0x22d   : > { %v700_v4 = vpop.f32.mrb[8].mxu0 }
 0x22e   : > { %v1631_v5 = vadd.f32 %v700_v4, %v594_v3  ;;  %v702_v6 = vpop.f32.mrb[9].mxu0 }
 0x22f   : > { %v1635_v8 = vadd.f32 %v702_v6, %v594_v3 }
 0x230   : > { %v1407_v11 = vpack.c.bf16 %v1631_v5, %v1637_v9 }
 0x231   : > { %v1405_v10 = vpack.c.bf16 %v1635_v8, %v1633_v7 }
 0x233   : > { %1406 = vmatprep.subr.bf16.mxu1 %v1405_v10 }
 0x234   : > { %1408 = vmatpush1.bf16.msra.mxu1 %v1407_v11 }
 0x237   : > { %1339 = vmatmul.mubr.msk.f32.vlgmr.msra.gmra.mrb[2].mxu1 %vm379_vm0, %v705_v12 }
 0x238   : > { %791 = vmatprep.mubr.f32.mxu1 %v1470_v18 }
 0x23b   : > { %1340 = vmatmul.mubr.msk.f32.gmra.mrb[4].mxu1 %vm379_vm0, %v706_v13 }
 0x23c   : > { %797 = vmatprep.mubr.f32.mxu1 %v1470_v18 }
 0x23f   : > { %1341 = vmatmul.mubr.msk.f32.gmra.mrb[6].mxu1 %vm379_vm0, %v707_v14 }
 0x240   : > { %803 = vmatprep.mubr.f32.mxu1 %v1470_v18 }
 0x243   : > { %1342 = vmatmul.mubr.msk.f32.gmra.mrb[8].mxu1 %vm379_vm0, %v708_v15 }
 0x244   : > { %1132 = vmatprep.mubr.f32.mxu1 %v1470_v18 }
 0x2a0   : > { %v934_v3 = vpop.trf.xlu1 }
 0x2a4   : > { %v935_v12 = vpop.trf.xlu1 }
 0x2a8   : > { %v936_v13 = vpop.trf.xlu1 }
 0x2ac   : > { %v937_v14 = vpop.trf.xlu1 }
 0x30a   : > { %v787_v16 = vpop.f32.mrb[2].mxu1 }
 0x30b   : > { %v789_v17 = vpop.f32.mrb[3].mxu1 }
 0x30e   : > { %v793_v19 = vpop.f32.mrb[4].mxu1 }
 0x30f   : > { %v1411_v20 = vpack.c.bf16 %v793_v19, %v787_v16  ;;  %v795_v21 = vpop.f32.mrb[5].mxu1 }
 0x310   : > { %v1409_v22 = vpack.c.bf16 %v795_v21, %v789_v17 }
 0x312   : > { %v799_v23 = vpop.f32.mrb[6].mxu1  ;;  %1410 = vmatprep.subr.bf16.mxu0 %v1409_v22 }
 0x313   : > { %v801_v24 = vpop.f32.mrb[7].mxu1  ;;  %1412 = vmatpush1.bf16.msra.mxu0 %v1411_v20 }
 0x316   : > { %v805_v25 = vpop.f32.mrb[8].mxu1 }
 0x317   : > { %v1415_v26 = vpack.c.bf16 %v805_v25, %v799_v23  ;;  %v807_v27 = vpop.f32.mrb[9].mxu1 }
 0x318   : > { %v1413_v28 = vpack.c.bf16 %v807_v27, %v801_v24 }
 0x31a   : > { %1414 = vmatprep.subr.bf16.mxu0 %v1413_v28  ;;  %v1052_v28 = vld [vmem:[%s1722_s8] sm:$0xff] }
 0x31b   : > { %1416 = vmatpush1.bf16.msra.mxu0 %v1415_v26 }
 0x31e   : > { %1343 = vmatmul.mubr.msk.f32.vlgmr.msra.gmra.mrb[10].mxu0 %vm379_vm0, %v486_v30  ;;  %v1054_v30 = vld [vmem:[%s1722_s8 + $0x10] sm:$0xff] }
 0x31f   : > { %1027 = vmatprep.mubr.f32.mxu0 %v1470_v18 }
 0x3f1   : > { %v879_v31 = vpop.f32.mrb[10].mxu0 }
 0x3f2   : > { %v884_v32 = vrot.slane %v879_v31, 4  ;;  %v881_v33 = vpop.f32.mrb[11].mxu0 }
 0x3f3   : > { %v890_v34 = vrot.slane %v881_v33, 4 }
 0x3f4   : > { %v885_v35 = vmax.f32 %v879_v31, %v884_v32  ;;  %v1166_v32 = vld [vmem:[%s1717_s3] sm:$0xf] }
 0x3f5   : > { %v891_v36 = vmax.f32 %v881_v33, %v890_v34 }
 0x3f6   : > { %v886_v37 = vrot.slane %v885_v35, 2 }
 0x3f7   : > { %v892_v38 = vrot.slane %v891_v36, 2 }
 0x3f8   : > { %v887_v39 = vmax.f32 %v885_v35, %v886_v37 }
 0x3f9   : > { %v893_v40 = vmax.f32 %v891_v36, %v892_v38 }
 0x3fa   : > { %v888_v41 = vrot.slane %v887_v39, 1 }
 0x3fb   : > { %v894_v42 = vrot.slane %v893_v40, 1 }
 0x3fc   : > { %v889_v43 = vmax.f32 %v887_v39, %v888_v41 }
 0x3fd   : > { %v895_v44 = vmax.f32 %v893_v40, %v894_v42 }
 0x3fe   : > { %v896_v45 = vsub.f32 %v879_v31, %v889_v43  ;;  %v1055_v31 = vld [vmem:[%s1722_s8 + $0x18] sm:$0xff] }
 0x3ff   : > { %v897_v46 = vsub.f32 %v881_v33, %v895_v44  ;;  %v1472_v33 = vmov 1  }
 0x400   : > { %v898_v47 = vmul.f32 1.442695, %v896_v45  ;;  %1448 = vset.pattern.permute.xlu0 %v1472_v33 }
 0x401   : > { %v900_v48 = vmul.f32 1.442695, %v897_v46  ;;  %1169 = vperm.xlu0 %1448, %v1166_v32  }
 0x402   : > { %1452 = vpow2.f32 %v898_v47 }
 0x403   : > { %1454 = vpow2.f32 %v900_v48 }
 0x40c   : > { %v1453_v49 = vpop.eup %1452 }
 0x40d   : > { %v1455_v50 = vpop.eup %1454  ;;  %v902_v51 = vrot.slane %v1453_v49, 4 }
 0x40e   : > { %v908_v52 = vrot.slane %v1455_v50, 4 }
 0x40f   : > { %v903_v53 = vadd.f32 %v1453_v49, %v902_v51 }
 0x410   : > { %v909_v54 = vadd.f32 %v1455_v50, %v908_v52 }
 0x411   : > { %v904_v55 = vrot.slane %v903_v53, 2 }
 0x412   : > { %v910_v56 = vrot.slane %v909_v54, 2 }
 0x413   : > { %v905_v58 = vadd.f32 %v904_v55, %v903_v53 }
 0x414   : > { %v911_v62 = vadd.f32 %v910_v56, %v909_v54 }
 0x415   : > { %v906_v63 = vrot.slane %v905_v58, 1 }
 0x416   : > { %v912_v0 = vrot.slane %v911_v62, 1 }
 0x417   : > { %v907_v1 = vadd.f32 %v906_v63, %v905_v58 }
 0x418   : > { %v913_v2 = vadd.f32 %v912_v0, %v911_v62 }
 0x419   : > { %1456 = vrcp.f32 %v907_v1 }
 0x41a   : > { %1458 = vrcp.f32 %v913_v2 }
 0x423   : > { %v1457_v4 = vpop.eup %1456 }
 0x424   : > { %v1459_v6 = vpop.eup %1458  ;;  %v916_v11 = vmul.f32 %v1457_v4, %v1453_v49 }
 0x425   : > { %v917_v10 = vmul.f32 %v1459_v6, %v1455_v50 }
 0x427   : > { %963 = vmatprep.subr.mxu0 %v917_v10 }
 0x428   : > { %964 = vmatpush1.msra.mxu0 %v916_v11 }
 0x429   : > { %1344 = vmatmul.mubr.msk.f32.vlgmr.msra.gmra.mrb[12].mxu0 %vm950_vm4, %v934_v3 }
 0x42a   : > { %1033 = vmatprep.mubr.f32.mxu0 %v1470_v18 }
 0x42d   : > { %1345 = vmatmul.mubr.msk.f32.gmra.mrb[14].mxu0 %vm950_vm4, %v935_v12 }
 0x42e   : > { %1039 = vmatprep.mubr.f32.mxu0 %v1470_v18 }
 0x431   : > { %1346 = vmatmul.mubr.msk.f32.gmra.mrb[16].mxu0 %vm950_vm4, %v936_v13 }
 0x432   : > { %1045 = vmatprep.mubr.f32.mxu0 %v1470_v18 }
 0x435   : > { %1347 = vmatmul.mubr.msk.f32.gmra.mrb[18].mxu0 %vm950_vm4, %v937_v14 }
 0x436   : > { %1239 = vmatprep.mubr.f32.mxu0 %v1470_v18 }
 0x480   : > { %v1170_v50 = vpop.permute.xlu0 %1169 }
 0x4fc   : > { %v1029_v15 = vpop.f32.mrb[12].mxu0 }
 0x4fd   : > { %v1031_v16 = vpop.f32.mrb[13].mxu0 }
 0x500   : > { %v1035_v17 = vpop.f32.mrb[14].mxu0 }
 0x501   : > { %v1419_v19 = vpack.c.bf16 %v1035_v17, %v1029_v15  ;;  %v1037_v20 = vpop.f32.mrb[15].mxu0 }
 0x502   : > { %v1417_v21 = vpack.c.bf16 %v1037_v20, %v1031_v16 }
 0x504   : > { %v1041_v22 = vpop.f32.mrb[16].mxu0  ;;  %1418 = vmatprep.subr.bf16.mxu1 %v1417_v21 }
 0x505   : > { %v1043_v23 = vpop.f32.mrb[17].mxu0  ;;  %1420 = vmatpush1.bf16.msra.mxu1 %v1419_v19 }
 0x508   : > { %v1047_v24 = vpop.f32.mrb[18].mxu0 }
 0x509   : > { %v1423_v25 = vpack.c.bf16 %v1047_v24, %v1041_v22  ;;  %v1049_v26 = vpop.f32.mrb[19].mxu0 }
 0x50a   : > { %v1421_v27 = vpack.c.bf16 %v1049_v26, %v1043_v23 }
 0x50c   : > { %1422 = vmatprep.subr.bf16.mxu1 %v1421_v27 }
 0x50d   : > { %1424 = vmatpush1.bf16.msra.mxu1 %v1423_v25 }
 0x510   : > { %1348 = vmatmul.mubr.msk.f32.vlgmr.msra.gmra.mrb[10].mxu1 %vm379_vm0, %v1052_v28 }
 0x511   : > { %1138 = vmatprep.mubr.f32.mxu1 %v1470_v18 }
 0x514   : > { %1349 = vmatmul.mubr.msk.f32.gmra.mrb[12].mxu1 %vm379_vm0, %v1053_v29 }
 0x515   : > { %1144 = vmatprep.mubr.f32.mxu1 %v1470_v18 }
 0x518   : > { %1350 = vmatmul.mubr.msk.f32.gmra.mrb[14].mxu1 %vm379_vm0, %v1054_v30 }
 0x519   : > { %1150 = vmatprep.mubr.f32.mxu1 %v1470_v18 }
 0x51c   : > { %1351 = vmatmul.mubr.msk.f32.gmra.mrb[16].mxu1 %vm379_vm0, %v1055_v31 }
 0x5e3   : > { %v1134_v34 = vpop.f32.mrb[10].mxu1 }
 0x5e4   : > { %v1136_v35 = vpop.f32.mrb[11].mxu1  ;;  %v1157_v37 = vadd.f32 %v1134_v34, %v1625_v61 }
 0x5e5   : > { %v1158_v39 = vadd.f32 %v1136_v35, %v1621_v59 }
 0x5e7   : > { %v1140_v36 = vpop.f32.mrb[12].mxu1 }
 0x5e8   : > { %v1159_v18 = vadd.f32 %v1140_v36, %v1619_v57  ;;  %v1142_v38 = vpop.f32.mrb[13].mxu1 }
 0x5e9   : > { %v1160_v40 = vadd.f32 %v1142_v38, %v1623_v60  ;;  %v1165_v60 = vld [vmem:[%s1723_s9] sm:$0xf] }
 0x5ea   : > { %v1427_v41 = vpack.c.bf16 %v1159_v18, %v1157_v37 }
 0x5eb   : > { %v1425_v42 = vpack.c.bf16 %v1160_v40, %v1158_v39  ;;  %v1146_v43 = vpop.f32.mrb[14].mxu1 }
 0x5ec   : > { %v1148_v44 = vpop.f32.mrb[15].mxu1  ;;  %v1161_v46 = vadd.f32 %v1146_v43, %v1637_v9 }
 0x5ed   : > { %1426 = vmatprep.subr.bf16.mxu0 %v1425_v42  ;;  %v1162_v57 = vadd.f32 %v1148_v44, %v1633_v7 }
 0x5ee   : > { %1428 = vmatpush1.bf16.msra.mxu0 %v1427_v41 }
 0x5ef   : > { %v1152_v45 = vpop.f32.mrb[16].mxu1 }
 0x5f0   : > { %v1163_v47 = vadd.f32 %v1152_v45, %v1631_v5  ;;  %v1154_v61 = vpop.f32.mrb[17].mxu1 }
 0x5f1   : > { %v1164_v48 = vadd.f32 %v1154_v61, %v1635_v8 }
 0x5f2   : > { %v1431_v59 = vpack.c.bf16 %v1163_v47, %v1161_v46 }
 0x5f3   : > { %v1429_v49 = vpack.c.bf16 %v1164_v48, %v1162_v57 }
 0x5f5   : > { %1430 = vmatprep.subr.bf16.mxu0 %v1429_v49 }
 0x5f6   : > { %1432 = vmatpush1.bf16.msra.mxu0 %v1431_v59 }
 0x5f9   : > { %1352 = vmatmul.mubr.msk.f32.vlgmr.msra.gmra.mrb[20].mxu0 %vm379_vm0, %v1165_v60 }
 0x6cc   : > { %v1241_v9 = vpop.f32.mrb[20].mxu0 }
 0x6cd   : > { %v1242_v51 = vadd.f32 %v1241_v9, %v1170_v50  ;;  %v1243_v52 = vpop.f32.mrb[21].mxu0 }
 0x6ce   : > { %v1244_v5 = vadd.f32 %v1243_v52, %v1170_v50 }
 0x6d0   : > { %v1248_v7 = vcombine.low %v1242_v51, %v1244_v5 }
 0x6d2   : > { %1250 = vst [vmem:[%s376_s30] sm:$0xff] %v1248_v7 }
 0x6d3 PF: > { %s20_s13 = sadd.s32 1, %s1466_s13  }
 0x6d4   : > { %p17_p4 = scmp.ge.s32.totalorder %s20_s13, 4  }
 0x6d6   :  { %19 = sbr.rel (!%p17_p4) target bundleno = 1 (0x1), region = 93 }

</bundles_post_ra>
